<compile_context>
chip_gen: v7x
topology: tpu7x:2x2x1
jax: 0.10.0
libtpu: 0.0.40
codegen_flags: <defaults>
</compile_context>

<pallas_src>
import functools

import jax
import jax.numpy as jnp
from jax.experimental import pallas as pl
from jax.experimental.pallas import tpu as pltpu

EPS = 1e-5
NEG_SLOPE = 0.01  # PyTorch LeakyReLU default


def _lrelu(h):
    return jnp.where(h >= 0, h, NEG_SLOPE * h)


def lin_generator_kernel(
    x_ref,
    w1_ref, b1_ref,
    w2_ref, b2_ref,
    w3_ref, b3_ref,
    w4_ref, b4_ref,
    o_ref,
):
    h = x_ref[...]  # bf16 [TILE_N, nin]

    # fc1: (BN-folded) Linear + LeakyReLU
    h = jnp.dot(h, w1_ref[...], preferred_element_type=jnp.float32) + b1_ref[...]
    h = _lrelu(h).astype(jnp.bfloat16)

    # fc2
    h = jnp.dot(h, w2_ref[...], preferred_element_type=jnp.float32) + b2_ref[...]
    h = _lrelu(h).astype(jnp.bfloat16)

    # fc3
    h = jnp.dot(h, w3_ref[...], preferred_element_type=jnp.float32) + b3_ref[...]
    h = _lrelu(h).astype(jnp.bfloat16)

    # fc4: Linear(nh -> nout) + Tanh (no BN, no dropout).
    # nout is tiny (3 lanes) so the output block is not lane-dense; kept as the
    # natural [TILE_N, nout] layout since total output bytes are negligible.
    z = jnp.dot(h, w4_ref[...], preferred_element_type=jnp.float32) + b4_ref[...]
    o_ref[...] = jnp.tanh(z)


def _round_up(x, m):
    return ((x + m - 1) // m) * m


def lin_generator(x, kp, *, tile_n=256):
    """x: [N, nin] float32. kp: folded kernel params (see fold_bn_params)."""
    n, nin = x.shape
    nh = kp["w1"].shape[1]
    nout = kp["w4"].shape[1]

    # Pick the batch tile: multiple of 16 (bf16 sublane packing), capped at
    # tile_n; pad N up to a whole number of tiles (extra rows sliced off).
    tile_n = min(tile_n, _round_up(n, 16))
    n_pad = _round_up(n, tile_n)
    if n_pad != n:
        x = jnp.pad(x, ((0, n_pad - n), (0, 0)))
    x = x.astype(jnp.bfloat16)

    grid = (n_pad // tile_n,)

    tiled = lambda r, c: pl.BlockSpec((r, c), lambda i: (i, 0))       # batch-tiled
    resident = lambda r, c: pl.BlockSpec((r, c), lambda i: (0, 0))    # VMEM-resident

    in_specs = [
        tiled(tile_n, nin),
        resident(nin, nh), resident(1, nh),
        resident(nh, nh), resident(1, nh),
        resident(nh, nh), resident(1, nh),
        resident(nh, nout), resident(1, nout),
    ]
    out_specs = tiled(tile_n, nout)

    # VMEM budget: double-buffered x/out tiles + (conservatively doubled)
    # resident weights + headroom for f32 intermediates.
    weight_bytes = 2 * (nin * nh + 2 * nh * nh + nh * nout) + 4 * (3 * nh + nout)
    tile_bytes = 2 * (tile_n * nin * 2 + tile_n * nout * 4)
    interm_bytes = 4 * tile_n * nh * 4
    vmem_limit = int(min(max(2 * weight_bytes + tile_bytes + interm_bytes,
                             32 << 20), 64 << 20))

    flops = 2 * n_pad * (nin * nh + 2 * nh * nh + nh * nout)
    bytes_accessed = (
        n_pad * nin * 2 + n_pad * nout * 4 + weight_bytes
    )

    return pl.pallas_call(
        lin_generator_kernel,
        out_shape=jax.ShapeDtypeStruct((n_pad, nout), jnp.float32),
        grid=grid,
        in_specs=in_specs,
        out_specs=out_specs,
        compiler_params=pltpu.CompilerParams(
            dimension_semantics=("parallel",),
            vmem_limit_bytes=vmem_limit,
        ),
        cost_estimate=pl.CostEstimate(
            flops=flops,
            transcendentals=n_pad * nout,
            bytes_accessed=bytes_accessed,
        ),
    )(
        x,
        kp["w1"], kp["b1"],
        kp["w2"], kp["b2"],
        kp["w3"], kp["b3"],
        kp["w4"], kp["b4"],
    )[:n]


def init_params(key, nin, nh, nout):
    """Raw parameters matching the PyTorch module shapes.

    Linear weights stored as [in, out] (transpose of torch's [out, in]).
    BatchNorm parameters stored as [1, nh] row vectors.
    """
    ks = jax.random.split(key, 8)

    def lin(kw, fan_in, fan_out):
        bound = 1.0 / jnp.sqrt(fan_in)
        kw1, kw2 = jax.random.split(kw)
        w = jax.random.uniform(kw1, (fan_in, fan_out), jnp.float32, -bound, bound)
        b = jax.random.uniform(kw2, (1, fan_out), jnp.float32, -bound, bound)
        return w, b

    w1, b1 = lin(ks[0], nin, nh)
    w2, b2 = lin(ks[1], nh, nh)
    w3, b3 = lin(ks[2], nh, nh)
    w4, b4 = lin(ks[3], nh, nout)

    def bn(kb, n_feat):
        k1, k2, k3, k4 = jax.random.split(kb, 4)
        g = 1.0 + 0.1 * jax.random.normal(k1, (1, n_feat), jnp.float32)
        be = 0.1 * jax.random.normal(k2, (1, n_feat), jnp.float32)
        m = 0.1 * jax.random.normal(k3, (1, n_feat), jnp.float32)
        v = jnp.abs(1.0 + 0.1 * jax.random.normal(k4, (1, n_feat), jnp.float32))
        return g, be, m, v

    g1, be1, m1, v1 = bn(ks[4], nh)
    g2, be2, m2, v2 = bn(ks[5], nh)
    g3, be3, m3, v3 = bn(ks[6], nh)

    return dict(
        w1=w1, b1=b1, g1=g1, be1=be1, m1=m1, v1=v1,
        w2=w2, b2=b2, g2=g2, be2=be2, m2=m2, v2=v2,
        w3=w3, b3=b3, g3=g3, be3=be3, m3=m3, v3=v3,
        w4=w4, b4=b4,
    )


def fold_bn_params(p):
    """Fold eval-mode BatchNorm into the preceding Linear (one-time precompute).

    W' = W * (g * rsqrt(v + eps)),  b' = (b - m) * (g * rsqrt(v + eps)) + beta.
    Weights are cast to bf16 (MXU operands); biases stay f32 (post-accumulate).
    """
    def fold(w, b, g, be, m, v):
        s = g * jax.lax.rsqrt(v + EPS)           # [1, out]
        return (w * s).astype(jnp.bfloat16), (b - m) * s + be

    w1, b1 = fold(p["w1"], p["b1"], p["g1"], p["be1"], p["m1"], p["v1"])
    w2, b2 = fold(p["w2"], p["b2"], p["g2"], p["be2"], p["m2"], p["v2"])
    w3, b3 = fold(p["w3"], p["b3"], p["g3"], p["be3"], p["m3"], p["v3"])
    return dict(
        w1=w1, b1=b1, w2=w2, b2=b2, w3=w3, b3=b3,
        w4=p["w4"].astype(jnp.bfloat16), b4=p["b4"],
    )


def reference_forward(x, p):
    """Pure-JAX f32 reference with the *unfolded* eval-mode module math."""
    def layer(h, w, b, g, be, m, v):
        h = h @ w + b
        h = (h - m) / jnp.sqrt(v + EPS) * g + be
        return jnp.where(h >= 0, h, NEG_SLOPE * h)

    h = layer(x, p["w1"], p["b1"], p["g1"], p["be1"], p["m1"], p["v1"])
    h = layer(h, p["w2"], p["b2"], p["g2"], p["be2"], p["m2"], p["v2"])
    h = layer(h, p["w3"], p["b3"], p["g3"], p["be3"], p["m3"], p["v3"])
    return jnp.tanh(h @ p["w4"] + p["b4"])


if __name__ == "__main__":
    batch, nin, nh, nout = 8, 64, 32, 3
    key = jax.random.PRNGKey(0)
    kx, kp = jax.random.split(key)

    x = jax.random.normal(kx, (batch, nin), jnp.float32)
    raw_params = init_params(kp, nin, nh, nout)
    kernel_params = fold_bn_params(raw_params)

    out = lin_generator(x, kernel_params)
    out = jax.block_until_ready(out)

    ref = reference_forward(x, raw_params)
    assert out.shape == (batch, nout), out.shape
    # bf16 MXU operands -> loosened tolerance vs the f32 reference.
    assert jnp.allclose(out, ref, atol=3e-2, rtol=3e-2), (
        f"max abs err {jnp.max(jnp.abs(out - ref))}"
    )
    print("KERNEL_OK")
</pallas_src>

<mosaic_0001>
module attributes {stable_mosaic.version = 11 : i64} {
  func.func @lin_generator_kernel(%arg0: i32, %arg1: memref<16x64xbf16, #tpu.memory_space<vmem>>, %arg2: memref<64x32xbf16, #tpu.memory_space<vmem>>, %arg3: memref<1x32xf32, #tpu.memory_space<vmem>>, %arg4: memref<32x32xbf16, #tpu.memory_space<vmem>>, %arg5: memref<1x32xf32, #tpu.memory_space<vmem>>, %arg6: memref<32x32xbf16, #tpu.memory_space<vmem>>, %arg7: memref<1x32xf32, #tpu.memory_space<vmem>>, %arg8: memref<32x3xbf16, #tpu.memory_space<vmem>>, %arg9: memref<1x3xf32, #tpu.memory_space<vmem>>, %arg10: memref<16x3xf32, #tpu.memory_space<vmem>>) attributes {dimension_semantics = [#tpu.dimension_semantics<parallel>], iteration_bounds = array<i64: 1>, scalar_prefetch = 0 : i64, scratch_operands = 0 : i64, tpu.core_type = #tpu.core_type<tc>, window_params = [{transform_indices = @transform_0, window_bounds = array<i64: 16, 64>}, {pipeline_mode = #tpu.pipeline_mode<synchronous>, transform_indices = @transform_1, window_bounds = array<i64: 64, 32>}, {pipeline_mode = #tpu.pipeline_mode<synchronous>, transform_indices = @transform_2, window_bounds = array<i64: 1, 32>}, {pipeline_mode = #tpu.pipeline_mode<synchronous>, transform_indices = @transform_3, window_bounds = array<i64: 32, 32>}, {pipeline_mode = #tpu.pipeline_mode<synchronous>, transform_indices = @transform_4, window_bounds = array<i64: 1, 32>}, {pipeline_mode = #tpu.pipeline_mode<synchronous>, transform_indices = @transform_5, window_bounds = array<i64: 32, 32>}, {pipeline_mode = #tpu.pipeline_mode<synchronous>, transform_indices = @transform_6, window_bounds = array<i64: 1, 32>}, {pipeline_mode = #tpu.pipeline_mode<synchronous>, transform_indices = @transform_7, window_bounds = array<i64: 32, 3>}, {pipeline_mode = #tpu.pipeline_mode<synchronous>, transform_indices = @transform_8, window_bounds = array<i64: 1, 3>}, {transform_indices = @transform_9, window_bounds = array<i64: 16, 3>}]} {
    %c0 = arith.constant 0 : index
    %c0_0 = arith.constant 0 : index
    %0 = vector.load %arg1[%c0, %c0_0] : memref<16x64xbf16, #tpu.memory_space<vmem>>, vector<16x64xbf16>
    %c0_1 = arith.constant 0 : index
    %c0_2 = arith.constant 0 : index
    %1 = vector.load %arg2[%c0_1, %c0_2] : memref<64x32xbf16, #tpu.memory_space<vmem>>, vector<64x32xbf16>
    %cst = arith.constant dense<0.000000e+00> : vector<16x32xf32>
    %2 = tpu.matmul %0, %1, %cst {dimension_numbers = #tpu.dot_dimension_numbers<[1], [0], [0], [1], [0, 0, 1, 1], [], []>} : vector<16x64xbf16>, vector<64x32xbf16>, vector<16x32xf32> -> vector<16x32xf32>
    %c0_3 = arith.constant 0 : index
    %c0_4 = arith.constant 0 : index
    %3 = vector.load %arg3[%c0_3, %c0_4] : memref<1x32xf32, #tpu.memory_space<vmem>>, vector<1x32xf32>
    %4 = vector.broadcast %3 : vector<1x32xf32> to vector<16x32xf32>
    %5 = arith.addf %2, %4 : vector<16x32xf32>
    %cst_5 = arith.constant 0.000000e+00 : f32
    %6 = vector.broadcast %cst_5 : f32 to vector<16x32xf32>
    %7 = arith.cmpf oge, %5, %6 : vector<16x32xf32>
    %cst_6 = arith.constant 0.00999999977 : f32
    %8 = vector.broadcast %cst_6 : f32 to vector<16x32xf32>
    %9 = arith.mulf %8, %5 : vector<16x32xf32>
    %10 = arith.select %7, %5, %9 : vector<16x32xi1>, vector<16x32xf32>
    %11 = arith.truncf %10 : vector<16x32xf32> to vector<16x32xbf16>
    %c0_7 = arith.constant 0 : index
    %c0_8 = arith.constant 0 : index
    %12 = vector.load %arg4[%c0_7, %c0_8] : memref<32x32xbf16, #tpu.memory_space<vmem>>, vector<32x32xbf16>
    %cst_9 = arith.constant dense<0.000000e+00> : vector<16x32xf32>
    %13 = tpu.matmul %11, %12, %cst_9 {dimension_numbers = #tpu.dot_dimension_numbers<[1], [0], [0], [1], [0, 0, 1, 1], [], []>} : vector<16x32xbf16>, vector<32x32xbf16>, vector<16x32xf32> -> vector<16x32xf32>
    %c0_10 = arith.constant 0 : index
    %c0_11 = arith.constant 0 : index
    %14 = vector.load %arg5[%c0_10, %c0_11] : memref<1x32xf32, #tpu.memory_space<vmem>>, vector<1x32xf32>
    %15 = vector.broadcast %14 : vector<1x32xf32> to vector<16x32xf32>
    %16 = arith.addf %13, %15 : vector<16x32xf32>
    %cst_12 = arith.constant 0.000000e+00 : f32
    %17 = vector.broadcast %cst_12 : f32 to vector<16x32xf32>
    %18 = arith.cmpf oge, %16, %17 : vector<16x32xf32>
    %cst_13 = arith.constant 0.00999999977 : f32
    %19 = vector.broadcast %cst_13 : f32 to vector<16x32xf32>
    %20 = arith.mulf %19, %16 : vector<16x32xf32>
    %21 = arith.select %18, %16, %20 : vector<16x32xi1>, vector<16x32xf32>
    %22 = arith.truncf %21 : vector<16x32xf32> to vector<16x32xbf16>
    %c0_14 = arith.constant 0 : index
    %c0_15 = arith.constant 0 : index
    %23 = vector.load %arg6[%c0_14, %c0_15] : memref<32x32xbf16, #tpu.memory_space<vmem>>, vector<32x32xbf16>
    %cst_16 = arith.constant dense<0.000000e+00> : vector<16x32xf32>
    %24 = tpu.matmul %22, %23, %cst_16 {dimension_numbers = #tpu.dot_dimension_numbers<[1], [0], [0], [1], [0, 0, 1, 1], [], []>} : vector<16x32xbf16>, vector<32x32xbf16>, vector<16x32xf32> -> vector<16x32xf32>
    %c0_17 = arith.constant 0 : index
    %c0_18 = arith.constant 0 : index
    %25 = vector.load %arg7[%c0_17, %c0_18] : memref<1x32xf32, #tpu.memory_space<vmem>>, vector<1x32xf32>
    %26 = vector.broadcast %25 : vector<1x32xf32> to vector<16x32xf32>
    %27 = arith.addf %24, %26 : vector<16x32xf32>
    %cst_19 = arith.constant 0.000000e+00 : f32
    %28 = vector.broadcast %cst_19 : f32 to vector<16x32xf32>
    %29 = arith.cmpf oge, %27, %28 : vector<16x32xf32>
    %cst_20 = arith.constant 0.00999999977 : f32
    %30 = vector.broadcast %cst_20 : f32 to vector<16x32xf32>
    %31 = arith.mulf %30, %27 : vector<16x32xf32>
    %32 = arith.select %29, %27, %31 : vector<16x32xi1>, vector<16x32xf32>
    %33 = arith.truncf %32 : vector<16x32xf32> to vector<16x32xbf16>
    %c0_21 = arith.constant 0 : index
    %c0_22 = arith.constant 0 : index
    %34 = vector.load %arg8[%c0_21, %c0_22] : memref<32x3xbf16, #tpu.memory_space<vmem>>, vector<32x3xbf16>
    %cst_23 = arith.constant dense<0.000000e+00> : vector<16x3xf32>
    %35 = tpu.matmul %33, %34, %cst_23 {dimension_numbers = #tpu.dot_dimension_numbers<[1], [0], [0], [1], [0, 0, 1, 1], [], []>} : vector<16x32xbf16>, vector<32x3xbf16>, vector<16x3xf32> -> vector<16x3xf32>
    %c0_24 = arith.constant 0 : index
    %c0_25 = arith.constant 0 : index
    %36 = vector.load %arg9[%c0_24, %c0_25] : memref<1x3xf32, #tpu.memory_space<vmem>>, vector<1x3xf32>
    %37 = vector.broadcast %36 : vector<1x3xf32> to vector<16x3xf32>
    %38 = arith.addf %35, %37 : vector<16x3xf32>
    %39 = math.tanh %38 : vector<16x3xf32>
    %c0_26 = arith.constant 0 : index
    %c0_27 = arith.constant 0 : index
    %40 = vector.load %arg10[%c0_26, %c0_27] : memref<16x3xf32, #tpu.memory_space<vmem>>, vector<16x3xf32>
    tpu.vector_store %arg10[%c0_26, %c0_27], %39 {strides = array<i32>} : memref<16x3xf32, #tpu.memory_space<vmem>>, vector<16x3xf32>,
    return
  }
  func.func @transform_0(%arg0: i32) -> (i32, i32) {
    %c0_i32 = arith.constant 0 : i32
    %c0_i32_0 = arith.constant 0 : i32
    return %arg0, %c0_i32 : i32, i32
  }
  func.func @transform_1(%arg0: i32) -> (i32, i32) {
    %c0_i32 = arith.constant 0 : i32
    %c0_i32_0 = arith.constant 0 : i32
    %c0_i32_1 = arith.constant 0 : i32
    return %c0_i32, %c0_i32_0 : i32, i32
  }
  func.func @transform_2(%arg0: i32) -> (i32, i32) {
    %c0_i32 = arith.constant 0 : i32
    %c0_i32_0 = arith.constant 0 : i32
    %c0_i32_1 = arith.constant 0 : i32
    return %c0_i32, %c0_i32_0 : i32, i32
  }
  func.func @transform_3(%arg0: i32) -> (i32, i32) {
    %c0_i32 = arith.constant 0 : i32
    %c0_i32_0 = arith.constant 0 : i32
    %c0_i32_1 = arith.constant 0 : i32
    return %c0_i32, %c0_i32_0 : i32, i32
  }
  func.func @transform_4(%arg0: i32) -> (i32, i32) {
    %c0_i32 = arith.constant 0 : i32
    %c0_i32_0 = arith.constant 0 : i32
    %c0_i32_1 = arith.constant 0 : i32
    return %c0_i32, %c0_i32_0 : i32, i32
  }
  func.func @transform_5(%arg0: i32) -> (i32, i32) {
    %c0_i32 = arith.constant 0 : i32
    %c0_i32_0 = arith.constant 0 : i32
    %c0_i32_1 = arith.constant 0 : i32
    return %c0_i32, %c0_i32_0 : i32, i32
  }
  func.func @transform_6(%arg0: i32) -> (i32, i32) {
    %c0_i32 = arith.constant 0 : i32
    %c0_i32_0 = arith.constant 0 : i32
    %c0_i32_1 = arith.constant 0 : i32
    return %c0_i32, %c0_i32_0 : i32, i32
  }
  func.func @transform_7(%arg0: i32) -> (i32, i32) {
    %c0_i32 = arith.constant 0 : i32
    %c0_i32_0 = arith.constant 0 : i32
    %c0_i32_1 = arith.constant 0 : i32
    return %c0_i32, %c0_i32_0 : i32, i32
  }
  func.func @transform_8(%arg0: i32) -> (i32, i32) {
    %c0_i32 = arith.constant 0 : i32
    %c0_i32_0 = arith.constant 0 : i32
    %c0_i32_1 = arith.constant 0 : i32
    return %c0_i32, %c0_i32_0 : i32, i32
  }
  func.func @transform_9(%arg0: i32) -> (i32, i32) {
    %c0_i32 = arith.constant 0 : i32
    %c0_i32_0 = arith.constant 0 : i32
    return %arg0, %c0_i32 : i32, i32
  }
}

</mosaic_0001>

<bundles_post_ra>
// kernel: tpu_custom_call.1
= control target key start
LH: loop header
LB: loop body
LE: loop exit
PB: predicated region body
PF: predicated region fallthrough
CT: control target
= control target key end

     0   :  { %v442_v0 = vmov 0.0   ;;  %vm443_vm0 = vmmov 0   ;;  %vm79_vm1 = vcmask 523264   ;;  %vm154_vm4 = vcmask 261120   ;;  %s566_s1 = inlined_call_operand.vmem [shape: bf16[64,32], index: 1, kind: input, shape index: {}]   ;;  %s567_s0 = inlined_call_operand.vmem [shape: bf16[16,64], index: 0, kind: input, shape index: {}]   ;;  %s568_s3 = inlined_call_operand.vmem [shape: bf16[32,32], index: 3, kind: input, shape index: {}]   ;;  %s569_s2 = inlined_call_operand.vmem [shape: f32[1,32], index: 2, kind: input, shape index: {}]   ;;  %s570_s5 = inlined_call_operand.vmem [shape: bf16[32,32], index: 5, kind: input, shape index: {}]   ;;  %s571_s4 = inlined_call_operand.vmem [shape: f32[1,32], index: 4, kind: input, shape index: {}]   ;;  %s572_s7 = inlined_call_operand.vmem [shape: bf16[32,3], index: 7, kind: input, shape index: {}]   ;;  %s573_s6 = inlined_call_operand.vmem [shape: f32[1,32], index: 6, kind: input, shape index: {}]   ;;  %s574_s8 = inlined_call_operand.vmem [shape: f32[1,3], index: 8, kind: input, shape index: {}]   ;;  %s575_s9 = inlined_call_operand.vmem [shape: f32[16,3], index: 9, kind: output, shape index: {}]  }
   0x1   :  { %389 = vmatprep.subr.bf16.mxu0 %v442_v0  ;;  %v427_v1 = vld [vmem:[%s566_s1] sm:$0xff]   ;;  %397 = vmatprep.mubr.msk.bf16.mxu0 %vm443_vm0, %v442_v0  ;;  %v428_v2 = vld [vmem:[%s566_s1 + $0x8] sm:$0xff]   ;;  %v429_v3 = vld [vmem:[%s566_s1 + $0x10] sm:$0xff]   ;;  %vm349_vm9 = vcmask 23552  }
   0x2   :  { %401 = vmatprep.subr.bf16.mxu1 %v442_v0  ;;  %405 = vmatprep.mubr.msk.bf16.mxu1 %vm443_vm0, %v442_v0  ;;  %v430_v4 = vld [vmem:[%s566_s1 + $0x18] sm:$0xff]   ;;  %v431_v5 = vld [vmem:[%s567_s0] sm:$0xff]   ;;  %v433_v7 = vld [vmem:[%s568_s3 + $0x8] sm:$0xff]  }
   0x3   :  { %390 = vmatpush3.bf16.msra.mxu0 %v427_v1  ;;  %v432_v6 = vld [vmem:[%s568_s3] sm:$0xff]   ;;  %v435_v21 = vld [vmem:[%s570_s5 + $0x8] sm:$0xff]  }
   0x4   :  { %391 = vmatprep.subr.bf16.mxu0 %v442_v0  ;;  %402 = vmatpush3.bf16.msra.mxu1 %v432_v6  ;;  %v356_v8 = vld [vmem:[%s569_s2] ss:$0 sm:$0xff]  ;;  %v437_v35 = vld [vmem:[%s572_s7 + $0x8] sm:$0xff]  }
   0x5   :  { %403 = vmatprep.subr.bf16.mxu1 %v442_v0  ;;  %v434_v20 = vld [vmem:[%s570_s5] sm:$0xff]  }
   0x6   :  { %v363_v22 = vld [vmem:[%s571_s4] ss:$0 sm:$0xff] }
   0x7   :  { %392 = vmatpush3.bf16.msra.mxu0 %v428_v2  ;;  %v436_v34 = vld [vmem:[%s572_s7] sm:$0xff]  }
   0x8   :  { %393 = vmatprep.subr.bf16.mxu0 %v442_v0  ;;  %404 = vmatpush3.bf16.msra.mxu1 %v433_v7  ;;  %v367_v36 = vld [vmem:[%s573_s6] ss:$0 sm:$0xff] }
   0x9   :  { %409 = vmatprep.subr.bf16.mxu1 %v442_v0  ;;  %v371_v48 = vld [vmem:[%s574_s8] ss:$0 sm:$0xff] }
   0xb   :  { %394 = vmatpush3.bf16.msra.mxu0 %v429_v3 }
   0xc   :  { %395 = vmatprep.subr.bf16.mxu0 %v442_v0 }
   0xf   :  { %396 = vmatpush3.bf16.msra.mxu0 %v430_v4 }
  0x10   :  { %417 = vmatprep.subr.bf16.mxu0 %v442_v0 }
  0x12   :  { %398 = vmatmul.mubr.msk.bf16.vlgmr.msra.gmra.mrb[0].mxu0 %vm79_vm1, %v431_v5 }
  0x13   :  { %421 = vmatprep.mubr.msk.bf16.mxu0 %vm443_vm0, %v442_v0  ;;  %418 = vmatpush3.bf16.msra.mxu0 %v436_v34 }
  0x14   :  { %419 = vmatprep.subr.bf16.mxu0 %v442_v0 }
  0x17   :  { %420 = vmatpush3.bf16.msra.mxu0 %v437_v35 }
  0xe5   :  { %v117_v9 = vpop.f32.mrb[0].mxu0 }
  0xe6   :  { %v118_v10 = vadd.f32 %v356_v8, %v117_v9  ;;  %v399_v11 = vpop.f32.mrb[1].mxu0 }
  0xe7   :  { %v120_v12 = vpop.f32.mrb[2].mxu0 }
  0xe8   :  { %v126_v13 = vmul.f32 0.01, %v118_v10  ;;  %v121_v14 = vadd.f32 %v356_v8, %v120_v12  ;;  %v400_v15 = vpop.f32.mrb[3].mxu0  ;;  %vm124_vm2 = vcmp.ge.f32.partialorder %v118_v10, 0.0 }
  0xea   :  { %vm125_vm3 = vcmp.ge.f32.partialorder %v121_v14, 0.0  ;;  %v127_v16 = vmul.f32 0.01, %v121_v14  ;;  %v128_v17 = vsel %vm124_vm2, %v118_v10, %v126_v13 }
  0xec   :  { %v129_v18 = vsel %vm125_vm3, %v121_v14, %v127_v16 }
  0xed   :  { %v130_v19 = vpack.c.bf16 %v129_v18, %v128_v17 }
  0xef   :  { %406 = vmatmul.mubr.msk.bf16.vlgmr.msra.gmra.mrb[0].mxu1 %vm154_vm4, %v130_v19 }
  0xf0   :  { %413 = vmatprep.mubr.msk.bf16.mxu1 %vm443_vm0, %v442_v0  ;;  %410 = vmatpush3.bf16.msra.mxu1 %v434_v20 }
  0xf1   :  { %411 = vmatprep.subr.bf16.mxu1 %v442_v0 }
  0xf4   :  { %412 = vmatpush3.bf16.msra.mxu1 %v435_v21 }
 0x1c2   :  { %v192_v23 = vpop.f32.mrb[0].mxu1 }
 0x1c3   :  { %v193_v24 = vadd.f32 %v363_v22, %v192_v23  ;;  %v407_v25 = vpop.f32.mrb[1].mxu1 }
 0x1c4   :  { %v195_v26 = vpop.f32.mrb[2].mxu1 }
 0x1c5   :  { %v201_v27 = vmul.f32 0.01, %v193_v24  ;;  %v196_v28 = vadd.f32 %v363_v22, %v195_v26  ;;  %v408_v29 = vpop.f32.mrb[3].mxu1  ;;  %vm199_vm5 = vcmp.ge.f32.partialorder %v193_v24, 0.0 }
 0x1c7   :  { %vm200_vm6 = vcmp.ge.f32.partialorder %v196_v28, 0.0  ;;  %v202_v30 = vmul.f32 0.01, %v196_v28  ;;  %v203_v31 = vsel %vm199_vm5, %v193_v24, %v201_v27 }
 0x1c9   :  { %v204_v32 = vsel %vm200_vm6, %v196_v28, %v202_v30 }
 0x1ca   :  { %v205_v33 = vpack.c.bf16 %v204_v32, %v203_v31 }
 0x1cc   :  { %414 = vmatmul.mubr.msk.bf16.vlgmr.msra.gmra.mrb[4].mxu1 %vm154_vm4, %v205_v33 }
 0x29f   :  { %v266_v37 = vpop.f32.mrb[4].mxu1 }
 0x2a0   :  { %v267_v38 = vadd.f32 %v367_v36, %v266_v37  ;;  %v415_v39 = vpop.f32.mrb[5].mxu1 }
 0x2a1   :  { %v269_v40 = vpop.f32.mrb[6].mxu1 }
 0x2a2   :  { %v275_v41 = vmul.f32 0.01, %v267_v38  ;;  %v270_v42 = vadd.f32 %v367_v36, %v269_v40  ;;  %v416_v43 = vpop.f32.mrb[7].mxu1  ;;  %vm273_vm7 = vcmp.ge.f32.partialorder %v267_v38, 0.0 }
 0x2a4   :  { %vm274_vm8 = vcmp.ge.f32.partialorder %v270_v42, 0.0  ;;  %v276_v44 = vmul.f32 0.01, %v270_v42  ;;  %v277_v45 = vsel %vm273_vm7, %v267_v38, %v275_v41 }
 0x2a6   :  { %v278_v46 = vsel %vm274_vm8, %v270_v42, %v276_v44 }
 0x2a7   :  { %v279_v47 = vpack.c.bf16 %v278_v46, %v277_v45 }
 0x2a9   :  { %422 = vmatmul.mubr.msk.bf16.vlgmr.msra.gmra.mrb[4].mxu0 %vm154_vm4, %v279_v47 }
 0x37c   :  { %v340_v49 = vpop.f32.mrb[4].mxu0 }
 0x37d   :  { %v341_v50 = vadd.f32 %v371_v48, %v340_v49  ;;  %v423_v51 = vpop.f32.mrb[5].mxu0 }
 0x37e   :  { %v343_v52 = vpop.f32.mrb[6].mxu0 }
 0x37f   :  { %438 = vtanh.f32 %v341_v50  ;;  %v344_v53 = vadd.f32 %v371_v48, %v343_v52  ;;  %v424_v54 = vpop.f32.mrb[7].mxu0 }
 0x381   :  { %440 = vtanh.f32 %v344_v53 }
 0x389   :  { %v439_v55 = vpop.eup %438 }
 0x38a   :  { %350 = vst.msk [vmem:[%s575_s9] sm:$0xff] %vm349_vm9, %v439_v55 }
 0x38b   :  { %v441_v56 = vpop.eup %440 }
 0x38c   :  { %351 = vst.msk [vmem:[%s575_s9 + $0x8] sm:$0xff] %vm349_vm9, %v441_v56 }

</bundles_post_ra>
